<compile_context>
chip_gen: v7x
topology: tpu7x:2x2x1
jax: 0.10.0
libtpu: 0.0.40
codegen_flags: <defaults>
</compile_context>

<pallas_src>
import jax
import jax.numpy as jnp
from jax import lax
from jax.experimental import pallas as pl
from jax.experimental.pallas import tpu as pltpu

OUT_DIM = 5                     # out_dim in the PyTorch script
IN_FEATURES = 128               # self.enet._fc.in_features (synthetic, lane-friendly)
STEM_CH = 32
KSIZE = 3                       # stem conv 3x3, stride 2, pad 1
HEAD_DIM = 2 * OUT_DIM + 1      # cat([fc(x), fc2(x)], dim=1) -> 11


# ------------------------------ fused Pallas kernel ------------------------------ #

def _make_fused_kernel(tb, s):
    """Kernel closure over static batch-block / spatial sizes."""
    n = tb * s   # lane extent of the patch block

    def kernel(p_ref, ws_ref, bs_ref, wp_ref, bp_ref, wh_ref, bh_ref, o_ref):
        # p_ref : (K, n)            bf16 im2col patches, k = (tap*Cin + c), col = b*S + s
        # ws_ref: (STEM_CH, K)      stem weight, transposed (column orientation)
        # bs_ref: (STEM_CH, 1)
        # wp_ref: (IN_FEATURES, STEM_CH), bp_ref: (IN_FEATURES, 1)
        # wh_ref: (HEAD_DIM, IN_FEATURES), bh_ref: (HEAD_DIM, 1)   merged dual head
        # o_ref : (1, HEAD_DIM, tb)

        # bf16 in HBM (halved DMA bytes); cast immediately after load, f32 everywhere
        # else (works on v5e's f32-only VPU/EUP; v6e/v7x upcast is free).
        patches = p_ref[...].astype(jnp.float32)              # (K, n)

        # --- stem conv 3x3/s2 folded into ONE (32,K)x(K,n) MXU matmul ---
        y = jnp.dot(ws_ref[...], patches,
                    preferred_element_type=jnp.float32)       # (32, n)
        y = y + bs_ref[...]
        y = y * jax.nn.sigmoid(y)                              # swish on lane-dense vregs

        # --- global average pool per image as an MXU matmul ---
        # block-diagonal averaging matrix (n, tb): avg[col, b] = 1/s iff col in image b.
        col = lax.broadcasted_iota(jnp.int32, (n, tb), 0)
        blk = lax.broadcasted_iota(jnp.int32, (n, tb), 1)
        inside = (col >= blk * s) & (col < (blk + 1) * s)
        avg = jnp.where(inside, jnp.float32(1.0 / s), jnp.float32(0.0))
        pooled = jnp.dot(y, avg,
                         preferred_element_type=jnp.float32)   # (32, tb)

        # --- projection to backbone feature width + swish (column orientation) ---
        f = jnp.dot(wp_ref[...], pooled,
                    preferred_element_type=jnp.float32) + bp_ref[...]   # (128, tb)
        f = f * jax.nn.sigmoid(f)

        # --- fused dual head: cat([myfc(x), myfc2(x)], 1) as a single matmul ---
        out = jnp.dot(wh_ref[...], f,
                      preferred_element_type=jnp.float32) + bh_ref[...]  # (11, tb)
        o_ref[0] = out

    return kernel


# --------------------------------- glue / wrapper -------------------------------- #

def _pick_tb(batch, s):
    """Batch-block size: (tb*s) % 128 == 0 (lane-aligned blocks), batch % tb == 0,
    prefer >= 2 grid steps (v7x megacore) and a handful of images per step."""
    cands = [tb for tb in range(1, batch + 1)
             if batch % tb == 0 and (tb * s) % 128 == 0]
    if not cands:
        return batch                      # full-batch block (block dim == array dim)
    multi = [tb for tb in cands if batch // tb >= 2] or cands
    capped = [tb for tb in multi if tb <= 32] or multi
    return max(capped)


def init_params(key, in_ch=3):
    ks = jax.random.split(key, 8)
    p = {}
    p["stem_w"] = 0.1 * jax.random.normal(ks[0], (KSIZE * KSIZE * in_ch, STEM_CH), jnp.float32)
    p["stem_b"] = 0.1 * jax.random.normal(ks[1], (1, STEM_CH), jnp.float32)
    p["proj_w"] = 0.1 * jax.random.normal(ks[2], (STEM_CH, IN_FEATURES), jnp.float32)
    p["proj_b"] = 0.1 * jax.random.normal(ks[3], (1, IN_FEATURES), jnp.float32)
    # nn.Linear stores weight as (out, in); keep that convention, fold in glue.
    p["fc1_w"] = 0.1 * jax.random.normal(ks[4], (OUT_DIM, IN_FEATURES), jnp.float32)
    p["fc1_b"] = 0.1 * jax.random.normal(ks[5], (1, OUT_DIM), jnp.float32)
    p["fc2_w"] = 0.1 * jax.random.normal(ks[6], (OUT_DIM + 1, IN_FEATURES), jnp.float32)
    p["fc2_b"] = 0.1 * jax.random.normal(ks[7], (1, OUT_DIM + 1), jnp.float32)
    return p


def enetv2_forward(params, x_nchw):
    x = x_nchw.astype(jnp.float32)
    B, Cin, H, W = x.shape
    assert H % 2 == 0 and W % 2 == 0, "stem conv (3x3/s2, pad 1) expects even H, W"
    Ho, Wo = H // 2, W // 2
    S = Ho * Wo
    K = KSIZE * KSIZE * Cin

    TB = _pick_tb(B, S)
    nblk = B // TB
    n = TB * S

    # Wrapper-side im2col in ONE materialization (~2.25x input bytes): pad, take the
    # nine stride-2 taps, lay out as (K, B*S) so K sits on sublanes and batch*spatial
    # on lanes. Stored bf16 to halve the dominant HBM traffic into the kernel.
    xp = jnp.pad(x, ((0, 0), (0, 0), (1, 1), (1, 1)))
    taps = jnp.stack([xp[:, :, i:i + 2 * Ho:2, j:j + 2 * Wo:2]
                      for i in range(KSIZE) for j in range(KSIZE)], axis=0)  # (9,B,C,Ho,Wo)
    patches = jnp.transpose(taps, (0, 2, 1, 3, 4)).reshape(K, B * S)          # k = tap*C + c
    patches = patches.astype(jnp.bfloat16)

    # Static weight preprocessing (free at trace time): column orientation so the
    # kernel needs zero transposes; the two heads are merged into one (11, F) matmul.
    ws_t = params["stem_w"].T                                   # (32, K)
    bs_c = params["stem_b"].T                                   # (32, 1)
    wp_t = params["proj_w"].T                                   # (128, 32)
    bp_c = params["proj_b"].T                                   # (128, 1)
    wh_t = jnp.concatenate([params["fc1_w"], params["fc2_w"]], axis=0)    # (11, 128)
    bh_c = jnp.concatenate([params["fc1_b"], params["fc2_b"]], axis=1).T  # (11, 1)

    flops = (2 * B * S * K * STEM_CH                 # stem matmul
             + 2 * B * S * STEM_CH * TB              # pooling matmul
             + 2 * B * STEM_CH * IN_FEATURES         # projection
             + 2 * B * IN_FEATURES * HEAD_DIM)       # merged head
    transcendentals = B * S * STEM_CH + B * IN_FEATURES
    bytes_accessed = int(2 * patches.size
                         + 4 * (ws_t.size + bs_c.size + wp_t.size + bp_c.size
                                + wh_t.size + bh_c.size)
                         + 4 * nblk * HEAD_DIM * TB)

    out3 = pl.pallas_call(
        _make_fused_kernel(TB, S),
        out_shape=jax.ShapeDtypeStruct((nblk, HEAD_DIM, TB), jnp.float32),
        grid=(nblk,),
        in_specs=[
            pl.BlockSpec((K, n), lambda g: (0, g)),
            pl.BlockSpec((STEM_CH, K), lambda g: (0, 0)),
            pl.BlockSpec((STEM_CH, 1), lambda g: (0, 0)),
            pl.BlockSpec((IN_FEATURES, STEM_CH), lambda g: (0, 0)),
            pl.BlockSpec((IN_FEATURES, 1), lambda g: (0, 0)),
            pl.BlockSpec((HEAD_DIM, IN_FEATURES), lambda g: (0, 0)),
            pl.BlockSpec((HEAD_DIM, 1), lambda g: (0, 0)),
        ],
        out_specs=pl.BlockSpec((1, HEAD_DIM, TB), lambda g: (g, 0, 0)),
        compiler_params=pltpu.CompilerParams(
            dimension_semantics=("parallel",),
            vmem_limit_bytes=32 * 1024 * 1024,
        ),
        cost_estimate=pl.CostEstimate(flops=flops,
                                      transcendentals=transcendentals,
                                      bytes_accessed=bytes_accessed),
    )(patches, ws_t, bs_c, wp_t, bp_c, wh_t, bh_c)

    # (nblk, 11, TB) -> (B, 11); tiny wrapper-side transpose, keeps the kernel
    # completely transpose-free.
    return jnp.transpose(out3, (0, 2, 1)).reshape(B, HEAD_DIM)


# --------------------------- pure-JAX reference (checking) ------------------------ #

def _reference_forward(params, x_nchw):
    x = jnp.transpose(x_nchw.astype(jnp.float32), (0, 2, 3, 1))
    xp = jnp.pad(x, ((0, 0), (1, 1), (1, 1), (0, 0)))
    B, Hp, Wp, C = xp.shape
    Ho, Wo = (Hp - KSIZE) // 2 + 1, (Wp - KSIZE) // 2 + 1
    cols = [xp[:, i:i + 2 * Ho:2, j:j + 2 * Wo:2, :]
            for i in range(KSIZE) for j in range(KSIZE)]
    patches = jnp.concatenate(cols, axis=-1).reshape(B * Ho * Wo, KSIZE * KSIZE * C)
    y = patches @ params["stem_w"] + params["stem_b"]
    y = y * jax.nn.sigmoid(y)
    pooled = jnp.mean(y.reshape(B, Ho * Wo, STEM_CH), axis=1)
    f = pooled @ params["proj_w"] + params["proj_b"]
    f = f * jax.nn.sigmoid(f)
    y1 = f @ params["fc1_w"].T + params["fc1_b"]
    y2 = f @ params["fc2_w"].T + params["fc2_b"]
    return jnp.concatenate([y1, y2], axis=1)


if __name__ == "__main__":
    key = jax.random.PRNGKey(0)
    k_params, k_x = jax.random.split(key)
    params = init_params(k_params, in_ch=3)
    # B=4, Cin=3, 16x16 -> S=64, TB=2 -> 2 grid steps (both v7x TensorCores busy),
    # patch block (27, 128) is (8,128)-aligned.
    x = jax.random.normal(k_x, (4, 3, 16, 16), jnp.float32)   # NCHW, like PyTorch

    fwd = jax.jit(enetv2_forward)
    y = fwd(params, x)
    jax.block_until_ready(y)

    assert y.shape == (4, HEAD_DIM), y.shape
    assert bool(jnp.all(jnp.isfinite(y))), "non-finite output"

    ref = _reference_forward(params, x)
    max_err = float(jnp.max(jnp.abs(y - ref)))
    # bf16 storage of the im2col patches costs ~1e-3 abs error vs. the f32 reference.
    assert max_err < 2e-2, f"mismatch vs reference: max abs err {max_err}"

    print("KERNEL_OK")
</pallas_src>

<mosaic_0001>
module attributes {stable_mosaic.version = 11 : i64} {
  func.func @kernel(%arg0: i32, %arg1: memref<27x128xbf16, #tpu.memory_space<vmem>>, %arg2: memref<32x27xf32, #tpu.memory_space<vmem>>, %arg3: memref<32x1xf32, #tpu.memory_space<vmem>>, %arg4: memref<128x32xf32, #tpu.memory_space<vmem>>, %arg5: memref<128x1xf32, #tpu.memory_space<vmem>>, %arg6: memref<11x128xf32, #tpu.memory_space<vmem>>, %arg7: memref<11x1xf32, #tpu.memory_space<vmem>>, %arg8: memref<1x11x2xf32, #tpu.memory_space<vmem>>) attributes {dimension_semantics = [#tpu.dimension_semantics<parallel>], iteration_bounds = array<i64: 2>, scalar_prefetch = 0 : i64, scratch_operands = 0 : i64, tpu.core_type = #tpu.core_type<tc>, window_params = [{transform_indices = @transform_0, window_bounds = array<i64: 27, 128>}, {pipeline_mode = #tpu.pipeline_mode<synchronous>, transform_indices = @transform_1, window_bounds = array<i64: 32, 27>}, {pipeline_mode = #tpu.pipeline_mode<synchronous>, transform_indices = @transform_2, window_bounds = array<i64: 32, 1>}, {pipeline_mode = #tpu.pipeline_mode<synchronous>, transform_indices = @transform_3, window_bounds = array<i64: 128, 32>}, {pipeline_mode = #tpu.pipeline_mode<synchronous>, transform_indices = @transform_4, window_bounds = array<i64: 128, 1>}, {pipeline_mode = #tpu.pipeline_mode<synchronous>, transform_indices = @transform_5, window_bounds = array<i64: 11, 128>}, {pipeline_mode = #tpu.pipeline_mode<synchronous>, transform_indices = @transform_6, window_bounds = array<i64: 11, 1>}, {transform_indices = @transform_7, window_bounds = array<i64: 1, 11, 2>}]} {
    %c0 = arith.constant 0 : index
    %c0_0 = arith.constant 0 : index
    %0 = vector.load %arg1[%c0, %c0_0] : memref<27x128xbf16, #tpu.memory_space<vmem>>, vector<27x128xbf16>
    %1 = arith.extf %0 : vector<27x128xbf16> to vector<27x128xf32>
    %c0_1 = arith.constant 0 : index
    %c0_2 = arith.constant 0 : index
    %2 = vector.load %arg2[%c0_1, %c0_2] : memref<32x27xf32, #tpu.memory_space<vmem>>, vector<32x27xf32>
    %cst = arith.constant dense<0.000000e+00> : vector<32x128xf32>
    %3 = tpu.matmul %2, %1, %cst {dimension_numbers = #tpu.dot_dimension_numbers<[1], [0], [0], [1], [0, 0, 1, 1], [], []>} : vector<32x27xf32>, vector<27x128xf32>, vector<32x128xf32> -> vector<32x128xf32>
    %c0_3 = arith.constant 0 : index
    %c0_4 = arith.constant 0 : index
    %4 = vector.load %arg3[%c0_3, %c0_4] : memref<32x1xf32, #tpu.memory_space<vmem>>, vector<32x1xf32>
    %5 = vector.broadcast %4 : vector<32x1xf32> to vector<32x128xf32>
    %6 = arith.addf %3, %5 : vector<32x128xf32>
    %7 = arith.negf %6 : vector<32x128xf32>
    %8 = math.exp %7 : vector<32x128xf32>
    %cst_5 = arith.constant 1.000000e+00 : f32
    %9 = vector.broadcast %cst_5 : f32 to vector<32x128xf32>
    %10 = arith.addf %9, %8 : vector<32x128xf32>
    %11 = arith.divf %9, %10 : vector<32x128xf32>
    %12 = arith.mulf %6, %11 : vector<32x128xf32>
    %13 = tpu.iota {dimensions = array<i32: 0>} : vector<128x2xi32>
    %14 = tpu.iota {dimensions = array<i32: 1>} : vector<128x2xi32>
    %c64_i32 = arith.constant 64 : i32
    %15 = vector.broadcast %c64_i32 : i32 to vector<128x2xi32>
    %16 = arith.muli %14, %15 : vector<128x2xi32>
    %17 = arith.cmpi sge, %13, %16 : vector<128x2xi32>
    %c1_i32 = arith.constant 1 : i32
    %18 = vector.broadcast %c1_i32 : i32 to vector<128x2xi32>
    %19 = arith.addi %14, %18 : vector<128x2xi32>
    %c64_i32_6 = arith.constant 64 : i32
    %20 = vector.broadcast %c64_i32_6 : i32 to vector<128x2xi32>
    %21 = arith.muli %19, %20 : vector<128x2xi32>
    %22 = arith.cmpi slt, %13, %21 : vector<128x2xi32>
    %23 = arith.andi %17, %22 : vector<128x2xi1>
    %cst_7 = arith.constant 1.562500e-02 : f32
    %cst_8 = arith.constant 0.000000e+00 : f32
    %24 = vector.broadcast %cst_7 : f32 to vector<128x2xf32>
    %25 = vector.broadcast %cst_8 : f32 to vector<128x2xf32>
    %26 = arith.select %23, %24, %25 : vector<128x2xi1>, vector<128x2xf32>
    %cst_9 = arith.constant dense<0.000000e+00> : vector<32x2xf32>
    %27 = tpu.matmul %12, %26, %cst_9 {dimension_numbers = #tpu.dot_dimension_numbers<[1], [0], [0], [1], [0, 0, 1, 1], [], []>} : vector<32x128xf32>, vector<128x2xf32>, vector<32x2xf32> -> vector<32x2xf32>
    %c0_10 = arith.constant 0 : index
    %c0_11 = arith.constant 0 : index
    %28 = vector.load %arg4[%c0_10, %c0_11] : memref<128x32xf32, #tpu.memory_space<vmem>>, vector<128x32xf32>
    %cst_12 = arith.constant dense<0.000000e+00> : vector<128x2xf32>
    %29 = tpu.matmul %28, %27, %cst_12 {dimension_numbers = #tpu.dot_dimension_numbers<[1], [0], [0], [1], [0, 0, 1, 1], [], []>} : vector<128x32xf32>, vector<32x2xf32>, vector<128x2xf32> -> vector<128x2xf32>
    %c0_13 = arith.constant 0 : index
    %c0_14 = arith.constant 0 : index
    %30 = vector.load %arg5[%c0_13, %c0_14] : memref<128x1xf32, #tpu.memory_space<vmem>>, vector<128x1xf32>
    %31 = vector.broadcast %30 : vector<128x1xf32> to vector<128x2xf32>
    %32 = arith.addf %29, %31 : vector<128x2xf32>
    %33 = arith.negf %32 : vector<128x2xf32>
    %34 = math.exp %33 : vector<128x2xf32>
    %cst_15 = arith.constant 1.000000e+00 : f32
    %35 = vector.broadcast %cst_15 : f32 to vector<128x2xf32>
    %36 = arith.addf %35, %34 : vector<128x2xf32>
    %37 = arith.divf %35, %36 : vector<128x2xf32>
    %38 = arith.mulf %32, %37 : vector<128x2xf32>
    %c0_16 = arith.constant 0 : index
    %c0_17 = arith.constant 0 : index
    %39 = vector.load %arg6[%c0_16, %c0_17] : memref<11x128xf32, #tpu.memory_space<vmem>>, vector<11x128xf32>
    %cst_18 = arith.constant dense<0.000000e+00> : vector<11x2xf32>
    %40 = tpu.matmul %39, %38, %cst_18 {dimension_numbers = #tpu.dot_dimension_numbers<[1], [0], [0], [1], [0, 0, 1, 1], [], []>} : vector<11x128xf32>, vector<128x2xf32>, vector<11x2xf32> -> vector<11x2xf32>
    %c0_19 = arith.constant 0 : index
    %c0_20 = arith.constant 0 : index
    %41 = vector.load %arg7[%c0_19, %c0_20] : memref<11x1xf32, #tpu.memory_space<vmem>>, vector<11x1xf32>
    %42 = vector.broadcast %41 : vector<11x1xf32> to vector<11x2xf32>
    %43 = arith.addf %40, %42 : vector<11x2xf32>
    %c0_21 = arith.constant 0 : index
    %c0_22 = arith.constant 0 : index
    %c0_23 = arith.constant 0 : index
    %44 = vector.load %arg8[%c0_21, %c0_22, %c0_23] : memref<1x11x2xf32, #tpu.memory_space<vmem>>, vector<1x11x2xf32>
    %45 = vector.shape_cast %44 : vector<1x11x2xf32> to vector<11x2xf32>
    %46 = vector.shape_cast %43 : vector<11x2xf32> to vector<1x11x2xf32>
    tpu.vector_store %arg8[%c0_21, %c0_22, %c0_23], %46 {strides = array<i32>} : memref<1x11x2xf32, #tpu.memory_space<vmem>>, vector<1x11x2xf32>,
    return
  }
  func.func @transform_0(%arg0: i32) -> (i32, i32) {
    %c0_i32 = arith.constant 0 : i32
    %c0_i32_0 = arith.constant 0 : i32
    return %c0_i32, %arg0 : i32, i32
  }
  func.func @transform_1(%arg0: i32) -> (i32, i32) {
    %c0_i32 = arith.constant 0 : i32
    %c0_i32_0 = arith.constant 0 : i32
    %c0_i32_1 = arith.constant 0 : i32
    return %c0_i32, %c0_i32_0 : i32, i32
  }
  func.func @transform_2(%arg0: i32) -> (i32, i32) {
    %c0_i32 = arith.constant 0 : i32
    %c0_i32_0 = arith.constant 0 : i32
    %c0_i32_1 = arith.constant 0 : i32
    return %c0_i32, %c0_i32_0 : i32, i32
  }
  func.func @transform_3(%arg0: i32) -> (i32, i32) {
    %c0_i32 = arith.constant 0 : i32
    %c0_i32_0 = arith.constant 0 : i32
    %c0_i32_1 = arith.constant 0 : i32
    return %c0_i32, %c0_i32_0 : i32, i32
  }
  func.func @transform_4(%arg0: i32) -> (i32, i32) {
    %c0_i32 = arith.constant 0 : i32
    %c0_i32_0 = arith.constant 0 : i32
    %c0_i32_1 = arith.constant 0 : i32
    return %c0_i32, %c0_i32_0 : i32, i32
  }
  func.func @transform_5(%arg0: i32) -> (i32, i32) {
    %c0_i32 = arith.constant 0 : i32
    %c0_i32_0 = arith.constant 0 : i32
    %c0_i32_1 = arith.constant 0 : i32
    return %c0_i32, %c0_i32_0 : i32, i32
  }
  func.func @transform_6(%arg0: i32) -> (i32, i32) {
    %c0_i32 = arith.constant 0 : i32
    %c0_i32_0 = arith.constant 0 : i32
    %c0_i32_1 = arith.constant 0 : i32
    return %c0_i32, %c0_i32_0 : i32, i32
  }
  func.func @transform_7(%arg0: i32) -> (i32, i32, i32) {
    %c0_i32 = arith.constant 0 : i32
    %c0_i32_0 = arith.constant 0 : i32
    %c0_i32_1 = arith.constant 0 : i32
    return %arg0, %c0_i32, %c0_i32_0 : i32, i32, i32
  }
}

</mosaic_0001>

<bundles_post_ra>
// kernel: enetv2_forward.1
= control target key start
LH: loop header
LB: loop body
LE: loop exit
PB: predicated region body
PF: predicated region fallthrough
CT: control target
= control target key end

     0   :  { %s1761_s24 = smov 0   ;;  %s1763_s25 = smov 0   ;;  %s2110_s0 = inlined_call_operand.vmem [shape: bf16[27,256], index: 0, kind: input, shape index: {}]   ;;  %s2111_s1 = inlined_call_operand.vmem [shape: f32[32,27], index: 1, kind: input, shape index: {}]   ;;  %s2112_s2 = inlined_call_operand.vmem [shape: f32[32,1], index: 2, kind: input, shape index: {}]   ;;  %s2113_s3 = inlined_call_operand.vmem [shape: f32[128,32], index: 3, kind: input, shape index: {}]   ;;  %s2114_s4 = inlined_call_operand.vmem [shape: f32[128,1], index: 4, kind: input, shape index: {}]   ;;  %s2115_s5 = inlined_call_operand.vmem [shape: f32[11,128], index: 5, kind: input, shape index: {}]   ;;  %s2116_s6 = inlined_call_operand.vmem [shape: f32[11,1], index: 6, kind: input, shape index: {}]   ;;  %s2117_s7 = inlined_call_operand.vmem [shape: f32[2,11,2], index: 7, kind: output, shape index: {}]  }
   0x1   :  { %s1765_s26 = smov 0  }
   0x2 LB: > { %s1241_s27 = sadd.s32 4294967295, %s1716_s26   ;;  %s1778_s28 = sadd.s32 1, %s1716_s26   ;;  %s1716_s26 = sphi %s1765_s26, %s2122_s26   ;;  %s1712_s25 = sphi %s1763_s25, %s2121_s25   ;;  %s1708_s24 = sphi %s1761_s24, %s2120_s24  }
   0x3   : > { %s21_s29 = ssub.s32 %s1716_s26, %s1778_s28  ;;  %s24_s30 = sadd.s32 1, %s1712_s25 }
   0x4   : > { %p22_p0 = scmp.eq.s32.totalorder %s21_s29, 0  ;;  %p31_p1 = scmp.ne.s32.totalorder %s1712_s25, %s1708_s24 }
   0x5   : > { %p32_p2 = scmp.eq.s32.totalorder %s1716_s26, 0  ;;  %p1244_p4 = scmp.ge.s32.totalorder %s1716_s26, 2 }
   0x6   : > { %s1787_s8 = scalar_select %p22_p0, %s1712_s25, %s24_s30  }
   0x7   : > { %p33_p3 = por %p32_p2, %p31_p1  ;;  %227 = sbr.rel (%p1244_p4) target bundleno = 21 (0x15), region = 40 }
   0xe   : > { %230 = sbr.rel (!%p33_p3) target bundleno = 21 (0x15), region = 44  ;;  %s232_s9 = sand.u32 (%p33_p3), 1, %s1712_s25  }
   0xf   : > { %s1246_s10 = sshll.u32 (%p33_p3), %s1716_s26, 2  ;;  %s1245_s11 = sshll.u32 (%p33_p3), %s232_s9, 4 }
  0x10   : > { %s236_s14 = scalar_lea.vmem (%p33_p3), %s2110_s0, %s1246_s10  ;;  %s234_s15 = scalar_lea.vmem (%p33_p3), [#allocation2], %s1245_s11 }
  0x11   : > { %v252_v0 = vld [vmem:[%s236_s14] sm:$0xf] (%p33_p3)  ;;  %v254_v1 = vld [vmem:[%s236_s14 + $0x8] sm:$0xf] (%p33_p3)  ;;  %v256_v2 = vld [vmem:[%s236_s14 + $0x10] sm:$0xf] (%p33_p3) }
  0x12   : > { %253 = vst [vmem:[%s234_s15] sm:$0xf] (%p33_p3), %v252_v0  ;;  %255 = vst [vmem:[%s234_s15 + $0x4] sm:$0xf] (%p33_p3), %v254_v1  ;;  %v258_v3 = vld [vmem:[%s236_s14 + $0x18] sm:$0xf] (%p33_p3) }
  0x13   : > { %257 = vst [vmem:[%s234_s15 + $0x8] sm:$0xf] (%p33_p3), %v256_v2  ;;  %259 = vst [vmem:[%s234_s15 + $0xc] sm:$0xf] (%p33_p3), %v258_v3 }
  0x15 PF: > { %p1247_p5 = scmp.ge.s32.totalorder %s1716_s26, 1  ;;  %p289_p6 = scmp.lt.s32.totalorder %s1716_s26, 3 }
  0x17   : > { %p290_p7 = pnand %p1247_p5, %p289_p6 }
  0x18   : > { %s296_s16 = sand.u32 (!%p290_p7), 1, %s1708_s24   ;;  %vm381_vm0 = vcmask (!%p290_p7), 1042432   ;;  %v340_v4 = vld [vmem:[%s2111_s1] sm:$0xff] (!%p290_p7)  ;;  %vm368_vm1 = vcmask (!%p290_p7), 220160   ;;  %vm1718_vm2 = vmmov (!%p290_p7), 1   ;;  %v1719_v6 = vmov (!%p290_p7), 0  }
  0x19   : > { %293 = sbr.rel (%p290_p7) target bundleno = 998 (0x3e6), region = 85  ;;  %s1248_s19 = sshll.u32 (!%p290_p7), %s296_s16, 4  ;;  %1389 = vmatprep.mubr.msk.f32.mxu1 (!%p290_p7), %vm368_vm1, %v340_v4  ;;  %vm1802_vm3 = vmpackc.low (!%p290_p7), %vm381_vm0, %vm1718_vm2  ;;  %1611 = vset.pattern.permute.xlu0 (!%p290_p7), %v1719_v6  ;;  %v344_v7 = vld [vmem:[%s2112_s2] sm:$0xff] (!%p290_p7)  ;;  %v346_v8 = vld [vmem:[%s2112_s2 + $0x10] sm:$0xff] (!%p290_p7)  ;;  %v498_v34 = vlaneseq (!%p290_p7)  ;;  %v1720_v43 = vmov (!%p290_p7), 0.015625|0.015625  }
  0x1a   : > { %1612 = vset.pattern.permute.xlu1 (!%p290_p7), %v1719_v6  ;;  %s298_s24 = scalar_lea.vmem (!%p290_p7), [#allocation2], %s1248_s19  ;;  %350 = vperm.xlu0 (!%p290_p7), %1611, %v344_v7   ;;  %v345_v11 = vld [vmem:[%s2112_s2 + $0x8] sm:$0xff] (!%p290_p7)  ;;  %v347_v12 = vld [vmem:[%s2112_s2 + $0x18] sm:$0xff] (!%p290_p7)  ;;  %v685_v13 = vld [vmem:[%s2114_s4] sm:$0xff] (!%p290_p7)  ;;  %p327_p8 = scmp.lt.s32.totalorder (!%p290_p7), %s1241_s27, 1 }
  0x1b   : > { %v1312_v9 = vld [vmem:[%s298_s24] sm:$0xff] (!%p290_p7)   ;;  %360 = vperm.xlu1 (!%p290_p7), %1612, %v346_v8   ;;  %v1613_v10 = vld [vmem:[%s298_s24 + $0x8] sm:$0x3f] (!%p290_p7)   ;;  %v516_v35 = vand.u32 (!%p290_p7), 127, %v498_v34  ;;  %v1888_v36 = vshrl.u32 (!%p290_p7), %v498_v34, 7 }
  0x1c   : > { %1501 = vmatprep.subr.bf16.mxu1 (!%p290_p7), %v1312_v9  ;;  %v686_v14 = vld [vmem:[%s2114_s4 + $0x8] sm:$0xff] (!%p290_p7)  ;;  %v342_v16 = vld [vmem:[%s2111_s1 + $0x10] sm:$0xff] (!%p290_p7)  ;;  %v688_v18 = vld [vmem:[%s2114_s4 + $0x18] sm:$0xff] (!%p290_p7) }
  0x1d   : > { %1503 = vmatpush3.bf16.msra.mxu1 (!%p290_p7), %v1312_v9  ;;  %v341_v15 = vld [vmem:[%s2111_s1 + $0x8] sm:$0xff] (!%p290_p7)  ;;  %v687_v17 = vld [vmem:[%s2114_s4 + $0x10] sm:$0xff] (!%p290_p7)  ;;  %v343_v19 = vld [vmem:[%s2111_s1 + $0x18] sm:$0xff] (!%p290_p7)  ;;  %v534_v37 = vadd.s32 (!%p290_p7), 1, %v516_v35  ;;  %v500_v38 = vadd.s32 (!%p290_p7), 8, %v1888_v36  ;;  %v1891_v39 = vmul.u32 (!%p290_p7), 64, %v516_v35 }
  0x1e   : > { %1506 = vmatprep.subr.msk.bf16.mxu1 (!%p290_p7), %vm1802_vm3, %v1613_v10  ;;  %355 = vperm.xlu0 (!%p290_p7), %1611, %v345_v11   ;;  %v689_v20 = vld [vmem:[%s2114_s4 + $0x20] sm:$0xff] (!%p290_p7)  ;;  %v690_v21 = vld [vmem:[%s2114_s4 + $0x28] sm:$0xff] (!%p290_p7)  ;;  %v691_v22 = vld [vmem:[%s2114_s4 + $0x30] sm:$0xff] (!%p290_p7)  ;;  %v501_v41 = vadd.s32 (!%p290_p7), 16, %v1888_v36  ;;  %v502_v42 = vadd.s32 (!%p290_p7), 24, %v1888_v36  ;;  %v503_v44 = vadd.s32 (!%p290_p7), 32, %v1888_v36 }
  0x1f   : > { %365 = vperm.xlu1 (!%p290_p7), %1612, %v347_v12   ;;  %v692_v23 = vld [vmem:[%s2114_s4 + $0x38] sm:$0xff] (!%p290_p7)  ;;  %v693_v24 = vld [vmem:[%s2114_s4 + $0x40] sm:$0xff] (!%p290_p7)  ;;  %v694_v25 = vld [vmem:[%s2114_s4 + $0x48] sm:$0xff] (!%p290_p7)  ;;  %v1893_v40 = vmul.u32 (!%p290_p7), 64, %v534_v37  ;;  %vm518_vm4 = vcmp.ge.s32.totalorder (!%p290_p7), %v1888_v36, %v1891_v39  ;;  %vm519_vm5 = vcmp.ge.s32.totalorder (!%p290_p7), %v500_v38, %v1891_v39  ;;  %v504_v45 = vadd.s32 (!%p290_p7), 40, %v1888_v36 }
  0x20   : > { %v695_v26 = vld [vmem:[%s2114_s4 + $0x50] sm:$0xff]  ;;  %v696_v27 = vld [vmem:[%s2114_s4 + $0x58] sm:$0xff]  ;;  %v697_v28 = vld [vmem:[%s2114_s4 + $0x60] sm:$0xff]  ;;  %vm520_vm11 = vcmp.ge.s32.totalorder %v501_v41, %v1891_v39  ;;  %vm521_vm12 = vcmp.ge.s32.totalorder %v502_v42, %v1891_v39  ;;  %vm522_vm2 = vcmp.ge.s32.totalorder %v503_v44, %v1891_v39  ;;  %v505_v46 = vadd.s32 48, %v1888_v36  ;;  %s2124_s27 = smov (!%p327_p8, %s1241_s27), 1 }
  0x21   : > { %1509 = vmatpush3.bf16.msk.msra.mxu1 %vm1802_vm3, %v1613_v10  ;;  %v698_v29 = vld [vmem:[%s2114_s4 + $0x68] sm:$0xff]  ;;  %v699_v30 = vld [vmem:[%s2114_s4 + $0x70] sm:$0xff]  ;;  %v700_v31 = vld [vmem:[%s2114_s4 + $0x78] sm:$0xff]  ;;  %vm536_vm6 = vcmp.lt.s32.totalorder %v1888_v36, %v1893_v40  ;;  %vm537_vm7 = vcmp.lt.s32.totalorder %v500_v38, %v1893_v40  ;;  %vm538_vm13 = vcmp.lt.s32.totalorder %v501_v41, %v1893_v40  ;;  %vm539_vm14 = vcmp.lt.s32.totalorder %v502_v42, %v1893_v40  ;;  %s1310_s17 = sshll.u32 %s2124_s27, 4 }
  0x22   : > { %703 = vperm.xlu0 %1611, %v685_v13   ;;  %v1089_v32 = vld [vmem:[%s2116_s6] sm:$0xff]  ;;  %v1090_v33 = vld [vmem:[%s2116_s6 + $0x8] sm:$0x7]  ;;  %vm552_vm8 = vmand %vm518_vm4, %vm536_vm6  ;;  %vm523_vm3 = vcmp.ge.s32.totalorder %v504_v45, %v1891_v39  ;;  %vm540_vm4 = vcmp.lt.s32.totalorder %v503_v44, %v1893_v40  ;;  %v506_v47 = vadd.s32 56, %v1888_v36  ;;  %v507_v48 = vadd.s32 64, %v1888_v36  ;;  %s331_s20 = scalar_lea.vmem %s2117_s7, %s1310_s17 }
  0x23   : > { %708 = vperm.xlu1 %1612, %v686_v14   ;;  %vm553_vm9 = vmand %vm519_vm5, %vm537_vm7  ;;  %vm541_vm5 = vcmp.lt.s32.totalorder %v504_v45, %v1893_v40  ;;  %v508_v49 = vadd.s32 72, %v1888_v36  ;;  %v509_v50 = vadd.s32 80, %v1888_v36  ;;  %v510_v51 = vadd.s32 88, %v1888_v36  ;;  %v673_v34 = vld [vmem:[%s2113_s3 + $0x20] sm:$0xff]  ;;  %v674_v35 = vld [vmem:[%s2113_s3 + $0x28] sm:$0xff] }
  0x24   : > { %1390 = vmatmul.mubr.msk.f32.vlgmr.msra.gmra.mrb[0].mxu1 %vm368_vm1, %v341_v15  ;;  %vm1510_vm10 = vmpackc.low %vm553_vm9, %vm552_vm8  ;;  %vm524_vm9 = vcmp.ge.s32.totalorder %v505_v46, %v1891_v39  ;;  %v511_v52 = vadd.s32 96, %v1888_v36  ;;  %v512_v53 = vadd.s32 104, %v1888_v36  ;;  %v513_v54 = vadd.s32 112, %v1888_v36  ;;  %v676_v37 = vld [vmem:[%s2113_s3 + $0x38] sm:$0xff]  ;;  %v677_v38 = vld [vmem:[%s2113_s3 + $0x40] sm:$0xff] }
  0x25   : > { %1392 = vmatprep.mubr.msk.f32.mxu1 %vm368_vm1, %v342_v16  ;;  %1511 = vmatprep.subr.msk.bf16.mxu1 %vm1510_vm10, %v1720_v43  ;;  %vm554_vm15 = vmand %vm520_vm11, %vm538_vm13  ;;  %vm542_vm11 = vcmp.lt.s32.totalorder %v505_v46, %v1893_v40  ;;  %v514_v55 = vadd.s32 120, %v1888_v36  ;;  %v675_v36 = vld [vmem:[%s2113_s3 + $0x30] sm:$0xff]  ;;  %v680_v41 = vld [vmem:[%s2113_s3 + $0x58] sm:$0xff] }
  0x26   : > { %713 = vperm.xlu0 %1611, %v687_v17   ;;  %1513 = vmatpush3.bf16.msk.msra.mxu1 %vm1510_vm10, %v1720_v43  ;;  %vm555_vm0 = vmand %vm521_vm12, %vm539_vm14  ;;  %vm525_vm10 = vcmp.ge.s32.totalorder %v506_v47, %v1891_v39  ;;  %vm543_vm12 = vcmp.lt.s32.totalorder %v506_v47, %v1893_v40  ;;  %v681_v42 = vld [vmem:[%s2113_s3 + $0x60] sm:$0xff]  ;;  %v683_v44 = vld [vmem:[%s2113_s3 + $0x70] sm:$0xff] }
  0x27   : > { %718 = vperm.xlu1 %1612, %v688_v18   ;;  %vm556_vm6 = vmand %vm522_vm2, %vm540_vm4  ;;  %vm544_vm2 = vcmp.lt.s32.totalorder %v507_v48, %v1893_v40  ;;  %v684_v45 = vld [vmem:[%s2113_s3 + $0x78] sm:$0xff]  ;;  %v1087_v46 = vld [vmem:[%s2115_s5] sm:$0xff] }
  0x28   : > { %1393 = vmatmul.mubr.msk.f32.gmra.mrb[2].mxu1 %vm368_vm1, %v343_v19  ;;  %vm1514_vm1 = vmpackc.low %vm555_vm0, %vm554_vm15  ;;  %vm526_vm0 = vcmp.ge.s32.totalorder %v507_v48, %v1891_v39 }
  0x29   : > { %1515 = vmatprep.subr.msk.bf16.mxu1 %vm1514_vm1, %v1720_v43  ;;  %vm557_vm7 = vmand %vm523_vm3, %vm541_vm5  ;;  %vm545_vm3 = vcmp.lt.s32.totalorder %v508_v49, %v1893_v40 }
  0x2a   : > { %723 = vperm.xlu0 %1611, %v689_v20   ;;  %1517 = vmatpush3.bf16.msk.msra.mxu1 %vm1514_vm1, %v1720_v43  ;;  %vm1518_vm8 = vmpackc.low %vm557_vm7, %vm556_vm6  ;;  %vm527_vm1 = vcmp.ge.s32.totalorder %v508_v49, %v1891_v39  ;;  %vm528_vm7 = vcmp.ge.s32.totalorder %v509_v50, %v1891_v39 }
  0x2b   : > { %728 = vperm.xlu1 %1612, %v690_v21   ;;  %1519 = vmatprep.subr.msk.bf16.mxu1 %vm1518_vm8, %v1720_v43  ;;  %vm558_vm13 = vmand %vm524_vm9, %vm542_vm11  ;;  %vm546_vm9 = vcmp.lt.s32.totalorder %v509_v50, %v1893_v40 }
  0x2c   : > { %vm559_vm14 = vmand %vm525_vm10, %vm543_vm12  ;;  %vm547_vm10 = vcmp.lt.s32.totalorder %v510_v51, %v1893_v40 }
  0x2d   : > { %vm1522_vm15 = vmpackc.low %vm559_vm14, %vm558_vm13  ;;  %vm530_vm14 = vcmp.ge.s32.totalorder %v511_v52, %v1891_v39 }
  0x2e   : > { %733 = vperm.xlu0 %1611, %v691_v22   ;;  %1521 = vmatpush3.bf16.msk.msra.mxu1 %vm1518_vm8, %v1720_v43  ;;  %vm560_vm4 = vmand %vm526_vm0, %vm544_vm2  ;;  %vm529_vm8 = vcmp.ge.s32.totalorder %v510_v51, %v1891_v39  ;;  %vm548_vm0 = vcmp.lt.s32.totalorder %v511_v52, %v1893_v40 }
  0x2f   : > { %738 = vperm.xlu1 %1612, %v692_v23   ;;  %1523 = vmatprep.subr.msk.bf16.mxu1 %vm1522_vm15, %v1720_v43  ;;  %vm561_vm5 = vmand %vm527_vm1, %vm545_vm3  ;;  %vm549_vm1 = vcmp.lt.s32.totalorder %v512_v53, %v1893_v40 }
  0x30   : > { %vm1526_vm6 = vmpackc.low %vm561_vm5, %vm560_vm4  ;;  %vm532_vm5 = vcmp.ge.s32.totalorder %v513_v54, %v1891_v39 }
  0x31   : > { %vm562_vm11 = vmand %vm528_vm7, %vm546_vm9  ;;  %vm550_vm7 = vcmp.lt.s32.totalorder %v513_v54, %v1893_v40 }
  0x32   : > { %743 = vperm.xlu0 %1611, %v693_v24   ;;  %1525 = vmatpush3.bf16.msk.msra.mxu1 %vm1522_vm15, %v1720_v43  ;;  %vm563_vm12 = vmand %vm529_vm8, %vm547_vm10  ;;  %vm531_vm15 = vcmp.ge.s32.totalorder %v512_v53, %v1891_v39  ;;  %vm551_vm8 = vcmp.lt.s32.totalorder %v514_v55, %v1893_v40  ;;  %v669_v24 = vld [vmem:[%s2113_s3] sm:$0xff]  ;;  %v679_v40 = vld [vmem:[%s2113_s3 + $0x50] sm:$0xff] }
  0x33   : > { %748 = vperm.xlu1 %1612, %v694_v25   ;;  %1527 = vmatprep.subr.msk.bf16.mxu1 %vm1526_vm6, %v1720_v43  ;;  %vm1530_vm13 = vmpackc.low %vm563_vm12, %vm562_vm11  ;;  %vm781_vm12 = vcmask 261120  }
  0x34   : > { %vm564_vm2 = vmand %vm530_vm14, %vm548_vm0  ;;  %1441 = vmatprep.mubr.msk.f32.mxu0 %vm781_vm12, %v669_v24  ;;  %vm1176_vm14 = vcmask 15360  }
  0x35   : > { %vm565_vm3 = vmand %vm531_vm15, %vm549_vm1 }
  0x36   : > { %753 = vperm.xlu0 %1611, %v695_v26   ;;  %1529 = vmatpush3.bf16.msk.msra.mxu1 %vm1526_vm6, %v1720_v43  ;;  %vm1534_vm4 = vmpackc.low %vm565_vm3, %vm564_vm2  ;;  %vm533_vm6 = vcmp.ge.s32.totalorder %v514_v55, %v1891_v39  ;;  %v678_v39 = vld [vmem:[%s2113_s3 + $0x48] sm:$0xff] }
  0x37   : > { %758 = vperm.xlu1 %1612, %v696_v27   ;;  %1531 = vmatprep.subr.msk.bf16.mxu1 %vm1530_vm13, %v1720_v43  ;;  %vm566_vm9 = vmand %vm532_vm5, %vm550_vm7 }
  0x38   : > { %vm567_vm10 = vmand %vm533_vm6, %vm551_vm8 }
  0x39   : > { %vm1538_vm11 = vmpackc.low %vm567_vm10, %vm566_vm9 }
  0x3a   : > { %763 = vperm.xlu0 %1611, %v697_v28   ;;  %1533 = vmatpush3.bf16.msk.msra.mxu1 %vm1530_vm13, %v1720_v43  ;;  %vm1178_vm13 = vcmask 10240  }
  0x3b   : > { %768 = vperm.xlu1 %1612, %v698_v29   ;;  %1535 = vmatprep.subr.msk.bf16.mxu1 %vm1534_vm4, %v1720_v43 }
  0x3e   : > { %773 = vperm.xlu0 %1611, %v699_v30   ;;  %1537 = vmatpush3.bf16.msk.msra.mxu1 %vm1534_vm4, %v1720_v43 }
  0x3f   : > { %778 = vperm.xlu1 %1612, %v700_v31   ;;  %1539 = vmatprep.subr.msk.bf16.mxu1 %vm1538_vm11, %v1720_v43  ;;  %v670_v31 = vld [vmem:[%s2113_s3 + $0x8] sm:$0xff] }
  0x42   : > { %1093 = vperm.xlu0 %1611, %v1089_v32   ;;  %1541 = vmatpush3.bf16.msk.msra.mxu1 %vm1538_vm11, %v1720_v43  ;;  %v671_v32 = vld [vmem:[%s2113_s3 + $0x10] sm:$0xff]  ;;  %v682_v43 = vld [vmem:[%s2113_s3 + $0x68] sm:$0xff] }
  0x43   : > { %1098 = vperm.xlu1 %1612, %v1090_v33   ;;  %v672_v33 = vld [vmem:[%s2113_s3 + $0x18] sm:$0xff] }
  0x99   : > { %v351_v56 = vpop.permute.xlu0 %350 }
  0x9a   : > { %v361_v57 = vpop.permute.xlu1 %360 }
  0x9d   : > { %v356_v58 = vpop.permute.xlu0 %355 }
  0x9e   : > { %v366_v0 = vpop.permute.xlu1 %365 }
  0xa1   : > { %v704_v48 = vpop.permute.xlu0 %703 }
  0xa2   : > { %v709_v47 = vpop.permute.xlu1 %708 }
  0xa5   : > { %v714_v50 = vpop.permute.xlu0 %713 }
  0xa6   : > { %v719_v49 = vpop.permute.xlu1 %718 }
  0xa9   : > { %v724_v52 = vpop.permute.xlu0 %723 }
  0xaa   : > { %v729_v51 = vpop.permute.xlu1 %728 }
  0xf7   : > { %v1391_v59 = vpop.f32.mrb[0].mxu1 }
  0xf8   : > { %v457_v60 = vadd.f32 %v1391_v59, %v356_v58  ;;  %v451_v61 = vpop.f32.mrb[1].mxu1  ;;  %v739_v58 = vpop.permute.xlu1 %738 }
  0xf9   : > { %v452_v62 = vadd.f32 %v451_v61, %v351_v56  ;;  %v734_v61 = vpop.permute.xlu0 %733 }
  0xfa   : > { %v1257_v63 = vmul.f32 -1.442695, %v457_v60 }
  0xfb   : > { %v1256_v1 = vmul.f32 -1.442695, %v452_v62  ;;  %v1394_v2 = vpop.f32.mrb[2].mxu1 }
  0xfc   : > { %1614 = vpow2.f32 %v1257_v63  ;;  %v467_v3 = vadd.f32 %v1394_v2, %v366_v0  ;;  %v461_v4 = vpop.f32.mrb[3].mxu1 }
  0xfd   : > { %1616 = vpow2.f32 %v1256_v1  ;;  %v462_v5 = vadd.f32 %v461_v4, %v361_v57 }
  0xfe   : > { %v1259_v6 = vmul.f32 -1.442695, %v467_v3 }
  0xff   : > { %v1258_v7 = vmul.f32 -1.442695, %v462_v5 }
 0x100   : > { %1618 = vpow2.f32 %v1259_v6  ;;  %v749_v6 = vpop.permute.xlu1 %748 }
 0x101   : > { %1620 = vpow2.f32 %v1258_v7 }
 0x106   : > { %v1615_v8 = vpop.eup %1614 }
 0x107   : > { %v1617_v9 = vpop.eup %1616  ;;  %v483_v10 = vadd.f32 1.0, %v1615_v8  ;;  %v744_v8 = vpop.permute.xlu0 %743 }
 0x108   : > { %v482_v11 = vadd.f32 1.0, %v1617_v9 }
 0x109   : > { %1622 = vrcp.f32 %v483_v10 }
 0x10a   : > { %v1619_v12 = vpop.eup %1618  ;;  %1624 = vrcp.f32 %v482_v11 }
 0x10b   : > { %v1621_v13 = vpop.eup %1620  ;;  %v485_v14 = vadd.f32 1.0, %v1619_v12 }
 0x10c   : > { %v484_v15 = vadd.f32 1.0, %v1621_v13 }
 0x10d   : > { %1626 = vrcp.f32 %v485_v14 }
 0x10e   : > { %1628 = vrcp.f32 %v484_v15 }
 0x113   : > { %v1623_v16 = vpop.eup %1622 }
 0x114   : > { %v1625_v17 = vpop.eup %1624  ;;  %v495_v19 = vmul.f32 %v1623_v16, %v457_v60 }
 0x115   : > { %v494_v18 = vmul.f32 %v1625_v17, %v452_v62 }
 0x117   : > { %v1627_v20 = vpop.eup %1626  ;;  %1427 = vmatprep.mubr.f32.mxu1 %v494_v18  ;;  %v759_v18 = vpop.permute.xlu1 %758 }
 0x118   : > { %v1629_v21 = vpop.eup %1628  ;;  %1428 = vmatmul.mubr.f32.vlgmr.msra.gmra.mrb[4].mxu1 %v495_v19  ;;  %v497_v23 = vmul.f32 %v1627_v20, %v467_v3 }
 0x119   : > { %v496_v22 = vmul.f32 %v1629_v21, %v462_v5 }
 0x11b   : > { %1430 = vmatprep.mubr.f32.mxu1 %v496_v22  ;;  %v754_v22 = vpop.permute.xlu0 %753 }
 0x11c   : > { %1431 = vmatmul.mubr.f32.gmra.mrb[6].mxu1 %v497_v23 }
 0x1eb   : > { %v1429_v25 = vpop.f32.mrb[4].mxu1 }
 0x1ec   : > { %v650_v26 = vpop.f32.mrb[5].mxu1 }
 0x1ed   : > { %v1542_v27 = vpack.c.bf16 %v1429_v25, %v650_v26 }
 0x1ef   : > { %v1432_v28 = vpop.f32.mrb[6].mxu1  ;;  %1543 = vmatprep.subr.bf16.mxu0 %v1542_v27 }
 0x1f0   : > { %v660_v29 = vpop.f32.mrb[7].mxu1  ;;  %1545 = vmatpush3.bf16.msra.mxu0 %v1542_v27 }
 0x1f1   : > { %v1546_v30 = vpack.c.bf16 %v1432_v28, %v660_v29 }
 0x1f3   : > { %1547 = vmatprep.subr.bf16.mxu0 %v1546_v30 }
 0x1f4   : > { %1549 = vmatpush3.bf16.msra.mxu0 %v1546_v30 }
 0x1f7   : > { %1442 = vmatmul.mubr.msk.f32.vlgmr.msra.gmra.mrb[0].mxu0 %vm781_vm12, %v670_v31 }
 0x1f8   : > { %1444 = vmatprep.mubr.msk.f32.mxu0 %vm781_vm12, %v671_v32 }
 0x1fb   : > { %1445 = vmatmul.mubr.msk.f32.gmra.mrb[2].mxu0 %vm781_vm12, %v672_v33 }
 0x1fc   : > { %1447 = vmatprep.mubr.msk.f32.mxu0 %vm781_vm12, %v673_v34 }
 0x1ff   : > { %1448 = vmatmul.mubr.msk.f32.gmra.mrb[4].mxu0 %vm781_vm12, %v674_v35 }
 0x200   : > { %1450 = vmatprep.mubr.msk.f32.mxu0 %vm781_vm12, %v675_v36  ;;  %v769_v36 = vpop.permute.xlu1 %768 }
 0x203   : > { %1451 = vmatmul.mubr.msk.f32.gmra.mrb[6].mxu0 %vm781_vm12, %v676_v37 }
 0x204   : > { %1453 = vmatprep.mubr.msk.f32.mxu0 %vm781_vm12, %v677_v38 }
 0x207   : > { %1454 = vmatmul.mubr.msk.f32.gmra.mrb[8].mxu0 %vm781_vm12, %v678_v39  ;;  %v764_v39 = vpop.permute.xlu0 %763 }
 0x208   : > { %1456 = vmatprep.mubr.msk.f32.mxu0 %vm781_vm12, %v679_v40 }
 0x20b   : > { %1457 = vmatmul.mubr.msk.f32.gmra.mrb[10].mxu0 %vm781_vm12, %v680_v41 }
 0x20c   : > { %1459 = vmatprep.mubr.msk.f32.mxu0 %vm781_vm12, %v681_v42 }
 0x20f   : > { %1460 = vmatmul.mubr.msk.f32.gmra.mrb[12].mxu0 %vm781_vm12, %v682_v43 }
 0x210   : > { %1462 = vmatprep.mubr.msk.f32.mxu0 %vm781_vm12, %v683_v44 }
 0x213   : > { %1463 = vmatmul.mubr.msk.f32.gmra.mrb[14].mxu0 %vm781_vm12, %v684_v45 }
 0x214   : > { %1497 = vmatprep.mubr.f32.mxu0 %v1087_v46 }
 0x2ca   : > { %v1443_v53 = vpop.f32.mrb[0].mxu0 }
 0x2cb   : > { %v2026_v54 = vadd.f32 %v1443_v53, %v709_v47  ;;  %v896_v55 = vpop.f32.mrb[1].mxu0 }
 0x2cc   : > { %v2028_v56 = vadd.f32 %v896_v55, %v704_v48 }
 0x2cd   : > { %v1293_v57 = vmul.f32 -1.442695, %v2026_v54 }
 0x2ce   : > { %v1292_v59 = vmul.f32 -1.442695, %v2028_v56  ;;  %v1446_v60 = vpop.f32.mrb[2].mxu0 }
 0x2cf   : > { %1630 = vpow2.f32 %v1293_v57  ;;  %v2032_v62 = vadd.f32 %v1446_v60, %v719_v49  ;;  %v906_v63 = vpop.f32.mrb[3].mxu0 }
 0x2d0   : > { %1632 = vpow2.f32 %v1292_v59  ;;  %v2034_v0 = vadd.f32 %v906_v63, %v714_v50  ;;  %v774_v59 = vpop.permute.xlu0 %773 }
 0x2d1   : > { %v1295_v1 = vmul.f32 -1.442695, %v2032_v62 }
 0x2d2   : > { %v1294_v2 = vmul.f32 -1.442695, %v2034_v0  ;;  %v1449_v3 = vpop.f32.mrb[4].mxu0 }
 0x2d3   : > { %1634 = vpow2.f32 %v1295_v1  ;;  %v2038_v4 = vadd.f32 %v1449_v3, %v729_v51  ;;  %v916_v5 = vpop.f32.mrb[5].mxu0 }
 0x2d4   : > { %1636 = vpow2.f32 %v1294_v2  ;;  %v2040_v7 = vadd.f32 %v916_v5, %v724_v52  ;;  %v779_v52 = vpop.permute.xlu1 %778 }
 0x2d5   : > { %v1297_v9 = vmul.f32 -1.442695, %v2038_v4 }
 0x2d6   : > { %v1296_v10 = vmul.f32 -1.442695, %v2040_v7  ;;  %v1452_v11 = vpop.f32.mrb[6].mxu0 }
 0x2d7   : > { %1638 = vpow2.f32 %v1297_v9  ;;  %v2044_v12 = vadd.f32 %v1452_v11, %v739_v58  ;;  %v926_v13 = vpop.f32.mrb[7].mxu0 }
 0x2d8   : > { %1640 = vpow2.f32 %v1296_v10  ;;  %v2046_v14 = vadd.f32 %v926_v13, %v734_v61 }
 0x2d9   : > { %v1631_v15 = vpop.eup %1630  ;;  %v1299_v16 = vmul.f32 -1.442695, %v2044_v12 }
 0x2da   : > { %v1633_v17 = vpop.eup %1632  ;;  %v1024_v19 = vadd.f32 1.0, %v1631_v15  ;;  %v1298_v20 = vmul.f32 -1.442695, %v2046_v14  ;;  %v1455_v21 = vpop.f32.mrb[8].mxu0 }
 0x2db   : > { %v1023_v23 = vadd.f32 1.0, %v1633_v17  ;;  %1642 = vpow2.f32 %v1299_v16  ;;  %v2050_v24 = vadd.f32 %v1455_v21, %v749_v6  ;;  %v936_v25 = vpop.f32.mrb[9].mxu0 }
 0x2dc   : > { %1644 = vrcp.f32 %v1024_v19  ;;  %v2052_v26 = vadd.f32 %v936_v25, %v744_v8 }
 0x2dd   : > { %v1635_v27 = vpop.eup %1634  ;;  %1646 = vrcp.f32 %v1023_v23  ;;  %v1301_v28 = vmul.f32 -1.442695, %v2050_v24 }
 0x2de   : > { %v1637_v29 = vpop.eup %1636  ;;  %v1026_v30 = vadd.f32 1.0, %v1635_v27  ;;  %1648 = vpow2.f32 %v1298_v20  ;;  %v1300_v31 = vmul.f32 -1.442695, %v2052_v26  ;;  %v1458_v32 = vpop.f32.mrb[10].mxu0 }
 0x2df   : > { %v1025_v33 = vadd.f32 1.0, %v1637_v29  ;;  %1650 = vpow2.f32 %v1301_v28  ;;  %v2056_v34 = vadd.f32 %v1458_v32, %v759_v18  ;;  %v946_v35 = vpop.f32.mrb[11].mxu0 }
 0x2e0   : > { %1652 = vrcp.f32 %v1026_v30  ;;  %v2058_v37 = vadd.f32 %v946_v35, %v754_v22 }
 0x2e1   : > { %v1639_v38 = vpop.eup %1638  ;;  %1654 = vrcp.f32 %v1025_v33  ;;  %v1303_v40 = vmul.f32 -1.442695, %v2056_v34 }
 0x2e2   : > { %v1641_v41 = vpop.eup %1640  ;;  %v1028_v42 = vadd.f32 1.0, %v1639_v38  ;;  %1656 = vpow2.f32 %v1300_v31  ;;  %v1302_v43 = vmul.f32 -1.442695, %v2058_v37  ;;  %v1461_v44 = vpop.f32.mrb[12].mxu0 }
 0x2e3   : > { %v1027_v45 = vadd.f32 1.0, %v1641_v41  ;;  %1658 = vpow2.f32 %v1303_v40  ;;  %v2062_v46 = vadd.f32 %v1461_v44, %v769_v36  ;;  %v956_v47 = vpop.f32.mrb[13].mxu0 }
 0x2e4   : > { %1660 = vrcp.f32 %v1028_v42  ;;  %v2064_v48 = vadd.f32 %v956_v47, %v764_v39 }
 0x2e5   : > { %v1643_v49 = vpop.eup %1642  ;;  %1662 = vrcp.f32 %v1027_v45  ;;  %v1305_v50 = vmul.f32 -1.442695, %v2062_v46 }
 0x2e6   : > { %v1645_v51 = vpop.eup %1644  ;;  %v1030_v53 = vadd.f32 1.0, %v1643_v49  ;;  %1664 = vpow2.f32 %v1302_v43  ;;  %v1304_v55 = vmul.f32 -1.442695, %v2064_v48  ;;  %v1464_v57 = vpop.f32.mrb[14].mxu0 }
 0x2e7   : > { %v1647_v58 = vpop.eup %1646  ;;  %v1072_v60 = vmul.f32 %v1645_v51, %v2026_v54  ;;  %1666 = vpow2.f32 %v1305_v50  ;;  %v2069_v61 = vadd.f32 %v1464_v57, %v779_v52  ;;  %v966_v63 = vpop.f32.mrb[15].mxu0 }
 0x2e8   : > { %v1649_v1 = vpop.eup %1648  ;;  %v1071_v2 = vmul.f32 %v1647_v58, %v2028_v56  ;;  %1668 = vrcp.f32 %v1030_v53  ;;  %v2072_v3 = vadd.f32 %v966_v63, %v774_v59 }
 0x2e9   : > { %v1651_v5 = vpop.eup %1650  ;;  %v1029_v6 = vadd.f32 1.0, %v1649_v1  ;;  %1670 = vpow2.f32 %v1304_v55  ;;  %v1307_v8 = vmul.f32 -1.442695, %v2069_v61 }
 0x2ea   : > { %v1653_v9 = vpop.eup %1652  ;;  %v1032_v10 = vadd.f32 1.0, %v1651_v5  ;;  %v1306_v11 = vmul.f32 -1.442695, %v2072_v3  ;;  %v1550_v54 = vpack.c.bf16 %v1072_v60, %v1071_v2  ;;  %v1094_v60 = vpop.permute.xlu0 %1093 }
 0x2eb   : > { %v1655_v13 = vpop.eup %1654  ;;  %v1074_v15 = vmul.f32 %v1653_v9, %v2032_v62  ;;  %1672 = vrcp.f32 %v1029_v6 }
 0x2ec   : > { %v1657_v16 = vpop.eup %1656  ;;  %v1073_v56 = vmul.f32 %v1655_v13, %v2034_v0  ;;  %1674 = vrcp.f32 %v1032_v10  ;;  %1551 = vmatprep.subr.bf16.mxu0 %v1550_v54 }
 0x2ed   : > { %v1659_v17 = vpop.eup %1658  ;;  %v1031_v18 = vadd.f32 1.0, %v1657_v16  ;;  %1676 = vpow2.f32 %v1307_v8  ;;  %1553 = vmatpush3.bf16.msra.mxu0 %v1550_v54 }
 0x2ee   : > { %v1661_v19 = vpop.eup %1660  ;;  %v1034_v20 = vadd.f32 1.0, %v1659_v17  ;;  %1678 = vpow2.f32 %v1306_v11  ;;  %v1554_v21 = vpack.c.bf16 %v1074_v15, %v1073_v56 }
 0x2ef   : > { %v1663_v22 = vpop.eup %1662  ;;  %v1076_v23 = vmul.f32 %v1661_v19, %v2038_v4  ;;  %1680 = vrcp.f32 %v1031_v18 }
 0x2f0   : > { %v1665_v25 = vpop.eup %1664  ;;  %v1075_v62 = vmul.f32 %v1663_v22, %v2040_v7  ;;  %1682 = vrcp.f32 %v1034_v20  ;;  %1555 = vmatprep.subr.bf16.mxu0 %v1554_v21 }
 0x2f1   : > { %v1667_v0 = vpop.eup %1666  ;;  %v1033_v27 = vadd.f32 1.0, %v1665_v25  ;;  %1557 = vmatpush3.bf16.msra.mxu0 %v1554_v21 }
 0x2f2   : > { %v1669_v28 = vpop.eup %1668  ;;  %v1036_v29 = vadd.f32 1.0, %v1667_v0  ;;  %v1558_v30 = vpack.c.bf16 %v1076_v23, %v1075_v62 }
 0x2f3   : > { %v1671_v31 = vpop.eup %1670  ;;  %1684 = vrcp.f32 %v1033_v27  ;;  %v1078_v32 = vmul.f32 %v1669_v28, %v2044_v12 }
 0x2f4   : > { %1686 = vrcp.f32 %v1036_v29  ;;  %v1035_v33 = vadd.f32 1.0, %v1671_v31  ;;  %1559 = vmatprep.subr.bf16.mxu0 %v1558_v30 }
 0x2f5   : > { %v1673_v4 = vpop.eup %1672  ;;  %1561 = vmatpush3.bf16.msra.mxu0 %v1558_v30 }
 0x2f6   : > { %v1675_v35 = vpop.eup %1674  ;;  %v1077_v7 = vmul.f32 %v1673_v4, %v2046_v14  ;;  %1688 = vrcp.f32 %v1035_v33 }
 0x2f7   : > { %v1677_v36 = vpop.eup %1676  ;;  %v1080_v39 = vmul.f32 %v1675_v35, %v2050_v24 }
 0x2f8   : > { %v1679_v38 = vpop.eup %1678  ;;  %v1038_v40 = vadd.f32 1.0, %v1677_v36  ;;  %v1562_v41 = vpack.c.bf16 %v1078_v32, %v1077_v7 }
 0x2f9   : > { %v1681_v42 = vpop.eup %1680  ;;  %v1037_v43 = vadd.f32 1.0, %v1679_v38 }
 0x2fa   : > { %v1683_v44 = vpop.eup %1682  ;;  %v1079_v12 = vmul.f32 %v1681_v42, %v2052_v26  ;;  %1690 = vrcp.f32 %v1038_v40  ;;  %1563 = vmatprep.subr.bf16.mxu0 %v1562_v41 }
 0x2fb   : > { %1692 = vrcp.f32 %v1037_v43  ;;  %1565 = vmatpush3.bf16.msra.mxu0 %v1562_v41  ;;  %v1082_v45 = vmul.f32 %v1683_v44, %v2056_v34 }
 0x2fc   : > { %v1566_v47 = vpack.c.bf16 %v1080_v39, %v1079_v12 }
 0x2fd   : > { %v1685_v14 = vpop.eup %1684 }
 0x2fe   : > { %v1687_v49 = vpop.eup %1686  ;;  %v1081_v50 = vmul.f32 %v1685_v14, %v2058_v37  ;;  %1567 = vmatprep.subr.bf16.mxu0 %v1566_v47 }
 0x2ff   : > { %v1084_v24 = vmul.f32 %v1687_v49, %v2062_v46  ;;  %1569 = vmatpush3.bf16.msra.mxu0 %v1566_v47  ;;  %v1088_v46 = vld [vmem:[%s2115_s5 + $0x8] sm:$0x7] }
 0x300   : > { %v1689_v51 = vpop.eup %1688  ;;  %v1570_v52 = vpack.c.bf16 %v1082_v45, %v1081_v50 }
 0x301   : > { %v1083_v26 = vmul.f32 %v1689_v51, %v2064_v48  ;;  %v1099_v48 = vpop.permute.xlu1 %1098 }
 0x302   : > { %1571 = vmatprep.subr.bf16.mxu0 %v1570_v52 }
 0x303   : > { %1573 = vmatpush3.bf16.msra.mxu0 %v1570_v52  ;;  %v1574_v53 = vpack.c.bf16 %v1084_v24, %v1083_v26 }
 0x304   : > { %v1691_v55 = vpop.eup %1690 }
 0x305   : > { %v1693_v34 = vpop.eup %1692  ;;  %v1086_v57 = vmul.f32 %v1691_v55, %v2069_v61  ;;  %1575 = vmatprep.subr.bf16.mxu0 %v1574_v53 }
 0x306   : > { %v1085_v37 = vmul.f32 %v1693_v34, %v2072_v3 }
 0x307   : > { %1577 = vmatpush3.bf16.msra.mxu0 %v1574_v53 }
 0x308   : > { %v1578_v58 = vpack.c.bf16 %v1086_v57, %v1085_v37 }
 0x30a   : > { %1579 = vmatprep.subr.bf16.mxu0 %v1578_v58 }
 0x30b   : > { %1581 = vmatpush3.bf16.msra.mxu0 %v1578_v58 }
 0x30e   : > { %1498 = vmatmul.mubr.f32.vlgmr.msra.gmra.mrb[16].mxu0 %v1088_v46 }
 0x3e1   : > { %v1499_v59 = vpop.f32.mrb[16].mxu0 }
 0x3e2   : > { %v1173_v61 = vadd.f32 %v1499_v59, %v1099_v48  ;;  %v1167_v63 = vpop.f32.mrb[17].mxu0 }
 0x3e3   : > { %v1168_v1 = vadd.f32 %v1167_v63, %v1094_v60 }
 0x3e4   : > { %1179 = vst.msk [vmem:[%s331_s20 + $0x8] sm:$0x7] %vm1178_vm13, %v1173_v61 }
 0x3e5   : > { %1177 = vst.msk [vmem:[%s331_s20] sm:$0xff] %vm1176_vm14, %v1168_v1 }
 0x3e6 PF: > { %p14_p9 = scmp.ge.s32.totalorder %s1778_s28, 4   ;;  %s2120_s24 = smov %s1712_s25 }
 0x3e7   : > { %s2121_s25 = smov %s1787_s8  ;;  %s2122_s26 = smov %s1778_s28 }
 0x3e8   :  { %16 = sbr.rel (!%p14_p9) target bundleno = 2 (0x2), region = 124 }

</bundles_post_ra>
